<compile_context>
chip_gen: v5e
topology: v5e:2x2
jax: 0.10.0
libtpu: 0.0.40
codegen_flags: <defaults>
</compile_context>

<pallas_src>
import jax
import jax.numpy as jnp
from jax.experimental import pallas as pl
from jax.experimental.pallas import tpu as pltpu


def _round_up(x, m):
    return ((x + m - 1) // m) * m


# Tables at or below this size take the VMEM-resident fast path.  Kept small
# enough that 2x (pipeline buffering) + output tiles fits comfortably inside
# every generation's scoped-VMEM budget (v7x has only 64 MiB physical VMEM).
_RESIDENT_TABLE_MAX_BYTES = 4 * 1024 * 1024


def _gather_kernel(idx_ref, table_ref, out_ref, sem):
    """Gather rows of table_ref (HBM or VMEM) straight into the output tile.

    idx_ref:   (B_pad,) int32 node ids in SMEM (scalar prefetch)
    table_ref: (N, D)  embedding table (HBM ref or VMEM-resident block)
    out_ref:   (TB, D) output tile (VMEM, auto-pipelined writeback)
    sem:       ()      shared DMA semaphore for every row copy of this tile
    """
    i = pl.program_id(0)
    tb, _ = out_ref.shape
    n = table_ref.shape[0]

    def issue(r):
        row = idx_ref[i * tb + r]
        # Clamp so the DMA can never address outside the table
        # (torch.nn.Embedding would raise on out-of-range ids).
        row = jnp.minimum(jnp.maximum(row, 0), n - 1)
        pltpu.make_async_copy(
            table_ref.at[pl.ds(row, 1), :],
            out_ref.at[pl.ds(r, 1), :],   # DMA directly into the output tile
            sem,
        ).start()

    if tb <= 64:
        # Fully unrolled descriptor issue (tb is a trace-time constant):
        # back-to-back pushes through the vector-misc slot, no loop overhead.
        for r in range(tb):
            issue(r)
    else:
        # Partially unrolled issue loop for large tiles.
        def body(r, carry):
            issue(r)
            return carry

        jax.lax.fori_loop(0, tb, body, 0, unroll=8)

    # All row copies signal the same semaphore; one aggregate wait sized to
    # the full (TB, D) tile (= sum of the per-row byte counts, D is a
    # multiple of 128 and the table is f32) retires them all at once.
    pltpu.make_async_copy(out_ref, out_ref, sem).wait()
    # TODO(synk): cross-grid-step software pipelining of the row gathers
    # (P4 double buffer) could additionally hide DMA latency at tile edges.


def _select_tb(batch):
    b8 = _round_up(max(batch, 1), 8)
    if b8 <= 8:
        return 8
    # Aim for >= 2 batch tiles so both v7x TensorCores get work; cap the tile
    # at 256 rows (direct-to-out DMA keeps VMEM use tiny on all generations).
    return min(256, _round_up((b8 + 1) // 2, 8))


def node2vec_embedding_lookup(node_indices, emb_table, *, tb=None,
                              max_resident_bytes=_RESIDENT_TABLE_MAX_BYTES):
    """out[i] = emb_table[node_indices[i]] via a Pallas DMA-gather kernel."""
    B = int(node_indices.shape[0])
    N, D = emb_table.shape

    # Lane-dense output: pad the feature dim up to a multiple of 128 (no-op
    # for the default embedding_dim=128).
    d_pad = _round_up(D, 128)
    table = emb_table
    if d_pad != D:
        table = jnp.pad(emb_table, ((0, 0), (0, d_pad - D)))

    if tb is None:
        tb = _select_tb(B)
    tb = max(8, _round_up(tb, 8))
    b_pad = _round_up(max(B, 1), tb)

    idx = node_indices.astype(jnp.int32)
    if b_pad != B:
        # Padded slots gather row 0; they are sliced off below.
        idx = jnp.pad(idx, (0, b_pad - B))

    itemsize = jnp.dtype(table.dtype).itemsize
    table_bytes = N * d_pad * itemsize

    if table_bytes <= max_resident_bytes:
        # Fast path: one bulk HBM->VMEM DMA of the whole table (constant block
        # index => copied once and kept resident across grid steps), then the
        # per-row gathers are cheap local VMEM->VMEM copies.
        table_spec = pl.BlockSpec((N, d_pad), lambda i, idx_ref: (0, 0))
    else:
        # Large table: keep it in HBM and gather rows with per-row HBM DMAs.
        table_spec = pl.BlockSpec(memory_space=pl.ANY)

    out = pl.pallas_call(
        _gather_kernel,
        out_shape=jax.ShapeDtypeStruct((b_pad, d_pad), table.dtype),
        grid_spec=pltpu.PrefetchScalarGridSpec(
            num_scalar_prefetch=1,                      # node ids -> SMEM
            grid=(b_pad // tb,),
            in_specs=[table_spec],
            out_specs=pl.BlockSpec((tb, d_pad), lambda i, idx_ref: (i, 0)),
            scratch_shapes=[pltpu.SemaphoreType.DMA(())],
        ),
        compiler_params=pltpu.CompilerParams(
            dimension_semantics=("parallel",),          # megacore batch split
            vmem_limit_bytes=32 << 20,                  # safe on v5e/v6e/v7x
        ),
    )(idx, table)

    out = out[:B]
    if d_pad != D:
        out = out[:, :D]
    return out


class StructLayerPallas:
    """JAX/Pallas equivalent of StructLayer (forward pass only)."""

    def __init__(self, num_nodes, edge_index=None, embedding_dim=128, key=None):
        key = key if key is not None else jax.random.PRNGKey(0)
        self.num_nodes = num_nodes
        self.embedding_dim = embedding_dim
        # Node2Vec's nn.Embedding default init: standard normal.
        self.embedding_weight = jax.random.normal(
            key, (num_nodes, embedding_dim), dtype=jnp.float32
        )
        # TODO(synk): Node2Vec's random-walk sampling / negative-sampling loss
        # (edge_index, walk_length, p, q, ...) is training-time machinery and
        # is not part of forward(); not implemented.

    def __call__(self, node_indices, **kwargs):
        return node2vec_embedding_lookup(node_indices, self.embedding_weight,
                                         **kwargs)


if __name__ == "__main__":
    key = jax.random.PRNGKey(0)
    k_emb, k_idx = jax.random.split(key)

    num_nodes = 64
    embedding_dim = 128
    batch = 8

    layer = StructLayerPallas(num_nodes, embedding_dim=embedding_dim, key=k_emb)
    node_indices = jax.random.randint(k_idx, (batch,), 0, num_nodes, dtype=jnp.int32)

    # 1) VMEM-resident fast path (default for this 32 KiB table).
    out = jax.block_until_ready(layer(node_indices))
    ref = layer.embedding_weight[node_indices]
    assert out.shape == (batch, embedding_dim)
    assert out.dtype == jnp.float32
    assert jnp.allclose(out, ref), "mismatch vs reference gather (resident path)"

    # 2) Non-multiple-of-tile batch -> padding + a 2-tile grid (multi-tile path).
    node_indices2 = jax.random.randint(jax.random.PRNGKey(1), (13,), 0, num_nodes,
                                       dtype=jnp.int32)
    out2 = jax.block_until_ready(layer(node_indices2))
    ref2 = layer.embedding_weight[node_indices2]
    assert out2.shape == (13, embedding_dim)
    assert jnp.allclose(out2, ref2), "mismatch vs reference gather (padded batch)"

    # 3) Force the HBM per-row-DMA path (large-table branch) on the same data.
    out3 = jax.block_until_ready(layer(node_indices, max_resident_bytes=0))
    assert jnp.allclose(out3, ref), "mismatch vs reference gather (HBM path)"

    print("KERNEL_OK")
</pallas_src>

<mosaic_0001>
module attributes {stable_mosaic.version = 11 : i64} {
  func.func @_gather_kernel(%arg0: i32, %arg1: memref<8xi32, #tpu.memory_space<smem>>, %arg2: memref<64x128xf32, #tpu.memory_space<vmem>>, %arg3: memref<8x128xf32, #tpu.memory_space<vmem>>, %arg4: memref<!tpu.dma_semaphore, #tpu.memory_space<semaphore_mem>>) attributes {dimension_semantics = [#tpu.dimension_semantics<parallel>], iteration_bounds = array<i64: 1>, scalar_prefetch = 1 : i64, scratch_operands = 1 : i64, tpu.core_type = #tpu.core_type<tc>, window_params = [{pipeline_mode = #tpu.pipeline_mode<synchronous>, transform_indices = @transform_0, window_bounds = array<i64: 64, 128>}, {transform_indices = @transform_1, window_bounds = array<i64: 8, 128>}]} {
    %c8_i32 = arith.constant 8 : i32
    %0 = arith.muli %arg0, %c8_i32 : i32
    %c0_i32 = arith.constant 0 : i32
    %1 = arith.addi %0, %c0_i32 : i32
    %2 = arith.index_cast %1 : i32 to index
    %3 = memref.load %arg1[%2] : memref<8xi32, #tpu.memory_space<smem>>
    %c0_i32_0 = arith.constant 0 : i32
    %4 = arith.maxsi %3, %c0_i32_0 : i32
    %c63_i32 = arith.constant 63 : i32
    %5 = arith.minsi %4, %c63_i32 : i32
    %c0_i32_1 = arith.constant 0 : i32
    %6 = tpu.memref_slice %arg2[%5, %c0_i32_1] : memref<64x128xf32, #tpu.memory_space<vmem>> -> memref<1x128xf32, #tpu.memory_space<vmem>>
    %c0_i32_2 = arith.constant 0 : i32
    %c0_i32_3 = arith.constant 0 : i32
    %7 = tpu.memref_slice %arg3[%c0_i32_2, %c0_i32_3] : memref<8x128xf32, #tpu.memory_space<vmem>> -> memref<1x128xf32, #tpu.memory_space<vmem>>
    tpu.enqueue_dma source(%6 : memref<1x128xf32, #tpu.memory_space<vmem>>) target(%7 : memref<1x128xf32, #tpu.memory_space<vmem>>) target_semaphore(%arg4 : memref<!tpu.dma_semaphore, #tpu.memory_space<semaphore_mem>>)
    %c8_i32_4 = arith.constant 8 : i32
    %8 = arith.muli %arg0, %c8_i32_4 : i32
    %c1_i32 = arith.constant 1 : i32
    %9 = arith.addi %8, %c1_i32 : i32
    %10 = arith.index_cast %9 : i32 to index
    %11 = memref.load %arg1[%10] : memref<8xi32, #tpu.memory_space<smem>>
    %c0_i32_5 = arith.constant 0 : i32
    %12 = arith.maxsi %11, %c0_i32_5 : i32
    %c63_i32_6 = arith.constant 63 : i32
    %13 = arith.minsi %12, %c63_i32_6 : i32
    %c0_i32_7 = arith.constant 0 : i32
    %14 = tpu.memref_slice %arg2[%13, %c0_i32_7] : memref<64x128xf32, #tpu.memory_space<vmem>> -> memref<1x128xf32, #tpu.memory_space<vmem>>
    %c1_i32_8 = arith.constant 1 : i32
    %c0_i32_9 = arith.constant 0 : i32
    %15 = tpu.memref_slice %arg3[%c1_i32_8, %c0_i32_9] : memref<8x128xf32, #tpu.memory_space<vmem>> -> memref<1x128xf32, #tpu.memory_space<vmem>>
    tpu.enqueue_dma source(%14 : memref<1x128xf32, #tpu.memory_space<vmem>>) target(%15 : memref<1x128xf32, #tpu.memory_space<vmem>>) target_semaphore(%arg4 : memref<!tpu.dma_semaphore, #tpu.memory_space<semaphore_mem>>)
    %c8_i32_10 = arith.constant 8 : i32
    %16 = arith.muli %arg0, %c8_i32_10 : i32
    %c2_i32 = arith.constant 2 : i32
    %17 = arith.addi %16, %c2_i32 : i32
    %18 = arith.index_cast %17 : i32 to index
    %19 = memref.load %arg1[%18] : memref<8xi32, #tpu.memory_space<smem>>
    %c0_i32_11 = arith.constant 0 : i32
    %20 = arith.maxsi %19, %c0_i32_11 : i32
    %c63_i32_12 = arith.constant 63 : i32
    %21 = arith.minsi %20, %c63_i32_12 : i32
    %c0_i32_13 = arith.constant 0 : i32
    %22 = tpu.memref_slice %arg2[%21, %c0_i32_13] : memref<64x128xf32, #tpu.memory_space<vmem>> -> memref<1x128xf32, #tpu.memory_space<vmem>>
    %c2_i32_14 = arith.constant 2 : i32
    %c0_i32_15 = arith.constant 0 : i32
    %23 = tpu.memref_slice %arg3[%c2_i32_14, %c0_i32_15] : memref<8x128xf32, #tpu.memory_space<vmem>> -> memref<1x128xf32, #tpu.memory_space<vmem>>
    tpu.enqueue_dma source(%22 : memref<1x128xf32, #tpu.memory_space<vmem>>) target(%23 : memref<1x128xf32, #tpu.memory_space<vmem>>) target_semaphore(%arg4 : memref<!tpu.dma_semaphore, #tpu.memory_space<semaphore_mem>>)
    %c8_i32_16 = arith.constant 8 : i32
    %24 = arith.muli %arg0, %c8_i32_16 : i32
    %c3_i32 = arith.constant 3 : i32
    %25 = arith.addi %24, %c3_i32 : i32
    %26 = arith.index_cast %25 : i32 to index
    %27 = memref.load %arg1[%26] : memref<8xi32, #tpu.memory_space<smem>>
    %c0_i32_17 = arith.constant 0 : i32
    %28 = arith.maxsi %27, %c0_i32_17 : i32
    %c63_i32_18 = arith.constant 63 : i32
    %29 = arith.minsi %28, %c63_i32_18 : i32
    %c0_i32_19 = arith.constant 0 : i32
    %30 = tpu.memref_slice %arg2[%29, %c0_i32_19] : memref<64x128xf32, #tpu.memory_space<vmem>> -> memref<1x128xf32, #tpu.memory_space<vmem>>
    %c3_i32_20 = arith.constant 3 : i32
    %c0_i32_21 = arith.constant 0 : i32
    %31 = tpu.memref_slice %arg3[%c3_i32_20, %c0_i32_21] : memref<8x128xf32, #tpu.memory_space<vmem>> -> memref<1x128xf32, #tpu.memory_space<vmem>>
    tpu.enqueue_dma source(%30 : memref<1x128xf32, #tpu.memory_space<vmem>>) target(%31 : memref<1x128xf32, #tpu.memory_space<vmem>>) target_semaphore(%arg4 : memref<!tpu.dma_semaphore, #tpu.memory_space<semaphore_mem>>)
    %c8_i32_22 = arith.constant 8 : i32
    %32 = arith.muli %arg0, %c8_i32_22 : i32
    %c4_i32 = arith.constant 4 : i32
    %33 = arith.addi %32, %c4_i32 : i32
    %34 = arith.index_cast %33 : i32 to index
    %35 = memref.load %arg1[%34] : memref<8xi32, #tpu.memory_space<smem>>
    %c0_i32_23 = arith.constant 0 : i32
    %36 = arith.maxsi %35, %c0_i32_23 : i32
    %c63_i32_24 = arith.constant 63 : i32
    %37 = arith.minsi %36, %c63_i32_24 : i32
    %c0_i32_25 = arith.constant 0 : i32
    %38 = tpu.memref_slice %arg2[%37, %c0_i32_25] : memref<64x128xf32, #tpu.memory_space<vmem>> -> memref<1x128xf32, #tpu.memory_space<vmem>>
    %c4_i32_26 = arith.constant 4 : i32
    %c0_i32_27 = arith.constant 0 : i32
    %39 = tpu.memref_slice %arg3[%c4_i32_26, %c0_i32_27] : memref<8x128xf32, #tpu.memory_space<vmem>> -> memref<1x128xf32, #tpu.memory_space<vmem>>
    tpu.enqueue_dma source(%38 : memref<1x128xf32, #tpu.memory_space<vmem>>) target(%39 : memref<1x128xf32, #tpu.memory_space<vmem>>) target_semaphore(%arg4 : memref<!tpu.dma_semaphore, #tpu.memory_space<semaphore_mem>>)
    %c8_i32_28 = arith.constant 8 : i32
    %40 = arith.muli %arg0, %c8_i32_28 : i32
    %c5_i32 = arith.constant 5 : i32
    %41 = arith.addi %40, %c5_i32 : i32
    %42 = arith.index_cast %41 : i32 to index
    %43 = memref.load %arg1[%42] : memref<8xi32, #tpu.memory_space<smem>>
    %c0_i32_29 = arith.constant 0 : i32
    %44 = arith.maxsi %43, %c0_i32_29 : i32
    %c63_i32_30 = arith.constant 63 : i32
    %45 = arith.minsi %44, %c63_i32_30 : i32
    %c0_i32_31 = arith.constant 0 : i32
    %46 = tpu.memref_slice %arg2[%45, %c0_i32_31] : memref<64x128xf32, #tpu.memory_space<vmem>> -> memref<1x128xf32, #tpu.memory_space<vmem>>
    %c5_i32_32 = arith.constant 5 : i32
    %c0_i32_33 = arith.constant 0 : i32
    %47 = tpu.memref_slice %arg3[%c5_i32_32, %c0_i32_33] : memref<8x128xf32, #tpu.memory_space<vmem>> -> memref<1x128xf32, #tpu.memory_space<vmem>>
    tpu.enqueue_dma source(%46 : memref<1x128xf32, #tpu.memory_space<vmem>>) target(%47 : memref<1x128xf32, #tpu.memory_space<vmem>>) target_semaphore(%arg4 : memref<!tpu.dma_semaphore, #tpu.memory_space<semaphore_mem>>)
    %c8_i32_34 = arith.constant 8 : i32
    %48 = arith.muli %arg0, %c8_i32_34 : i32
    %c6_i32 = arith.constant 6 : i32
    %49 = arith.addi %48, %c6_i32 : i32
    %50 = arith.index_cast %49 : i32 to index
    %51 = memref.load %arg1[%50] : memref<8xi32, #tpu.memory_space<smem>>
    %c0_i32_35 = arith.constant 0 : i32
    %52 = arith.maxsi %51, %c0_i32_35 : i32
    %c63_i32_36 = arith.constant 63 : i32
    %53 = arith.minsi %52, %c63_i32_36 : i32
    %c0_i32_37 = arith.constant 0 : i32
    %54 = tpu.memref_slice %arg2[%53, %c0_i32_37] : memref<64x128xf32, #tpu.memory_space<vmem>> -> memref<1x128xf32, #tpu.memory_space<vmem>>
    %c6_i32_38 = arith.constant 6 : i32
    %c0_i32_39 = arith.constant 0 : i32
    %55 = tpu.memref_slice %arg3[%c6_i32_38, %c0_i32_39] : memref<8x128xf32, #tpu.memory_space<vmem>> -> memref<1x128xf32, #tpu.memory_space<vmem>>
    tpu.enqueue_dma source(%54 : memref<1x128xf32, #tpu.memory_space<vmem>>) target(%55 : memref<1x128xf32, #tpu.memory_space<vmem>>) target_semaphore(%arg4 : memref<!tpu.dma_semaphore, #tpu.memory_space<semaphore_mem>>)
    %c8_i32_40 = arith.constant 8 : i32
    %56 = arith.muli %arg0, %c8_i32_40 : i32
    %c7_i32 = arith.constant 7 : i32
    %57 = arith.addi %56, %c7_i32 : i32
    %58 = arith.index_cast %57 : i32 to index
    %59 = memref.load %arg1[%58] : memref<8xi32, #tpu.memory_space<smem>>
    %c0_i32_41 = arith.constant 0 : i32
    %60 = arith.maxsi %59, %c0_i32_41 : i32
    %c63_i32_42 = arith.constant 63 : i32
    %61 = arith.minsi %60, %c63_i32_42 : i32
    %c0_i32_43 = arith.constant 0 : i32
    %62 = tpu.memref_slice %arg2[%61, %c0_i32_43] : memref<64x128xf32, #tpu.memory_space<vmem>> -> memref<1x128xf32, #tpu.memory_space<vmem>>
    %c7_i32_44 = arith.constant 7 : i32
    %c0_i32_45 = arith.constant 0 : i32
    %63 = tpu.memref_slice %arg3[%c7_i32_44, %c0_i32_45] : memref<8x128xf32, #tpu.memory_space<vmem>> -> memref<1x128xf32, #tpu.memory_space<vmem>>
    tpu.enqueue_dma source(%62 : memref<1x128xf32, #tpu.memory_space<vmem>>) target(%63 : memref<1x128xf32, #tpu.memory_space<vmem>>) target_semaphore(%arg4 : memref<!tpu.dma_semaphore, #tpu.memory_space<semaphore_mem>>)
    tpu.wait_dma2 semaphore(%arg4 : memref<!tpu.dma_semaphore, #tpu.memory_space<semaphore_mem>>) src(%arg3 : memref<8x128xf32, #tpu.memory_space<vmem>>) dst(%arg3 : memref<8x128xf32, #tpu.memory_space<vmem>>)
    return
  }
  func.func @transform_0(%arg0: i32, %arg1: memref<8xi32, #tpu.memory_space<smem>>) -> (i32, i32) {
    %c0_i32 = arith.constant 0 : i32
    %c0_i32_0 = arith.constant 0 : i32
    %c0_i32_1 = arith.constant 0 : i32
    return %c0_i32, %c0_i32_0 : i32, i32
  }
  func.func @transform_1(%arg0: i32, %arg1: memref<8xi32, #tpu.memory_space<smem>>) -> (i32, i32) {
    %c0_i32 = arith.constant 0 : i32
    %c0_i32_0 = arith.constant 0 : i32
    return %arg0, %c0_i32 : i32, i32
  }
}

</mosaic_0001>

<bundles_post_ra>
// kernel: tpu_custom_call.1
= control target key start
LH: loop header
LB: loop body
LE: loop exit
PB: predicated region body
PF: predicated region fallthrough
CT: control target
= control target key end

     0   :  { %s572_s12 = smov [#allocation4]   ;;  %s601_s0 = inlined_call_operand.hbm [shape: s32[8], index: 0, kind: input, shape index: {}]   ;;  %s602_s1 = inlined_call_operand.hbm [shape: f32[64,128], index: 1, kind: input, shape index: {}]   ;;  %s603_s2 = inlined_call_operand.hbm [shape: f32[8,128], index: 2, kind: output, shape index: {}]  }
   0x1   :  { %s8_s11 = sshll.u32 %s601_s0, 4  ;;  %s9_s11 = int_to_ptr.hbm [resolvable:$true] %s8_s11 }
   0x2   :  { %11 = dma.hbm_to_smem %s9_s11, 16, %s572_s12, [#allocation3] }
   0x3   :  { %564 = dma.done.wait [#allocation3], 16 }
   0x4   :  { %565 = vsyncadd [#allocation3], 4294967280 }
   0x5   :  { %14 = sfence }
   0x6   :  { %15 = vsyncpa [#allocation6], 0 }
   0x7   :  { %16 = vsyncpa [#allocation7], 0  ;;  %s21_s15 = sshll.u32 %s602_s1, 4  ;;  %s573_s16 = smov [#allocation5]   ;;  %s22_s15 = int_to_ptr.hbm [resolvable:$true] %s21_s15 }
   0x8   :  { %s23_s17 = sshll.u32 %s573_s16, 4  ;;  %s574_s18 = smov 128   ;;  %s24_s17 = int_to_ptr.vmem [resolvable:$true] %s23_s17 }
   0x9   :  { %s575_s19 = smov 8  }
   0xa   :  { %29 = dma.hbm_to_vmem [thread:$0]  %s22_s15, 1024, %s24_s17, [#allocation6], %s574_s18, %s574_s18, %s575_s19  }
   0xb   :  { %566 = dma.done.wait [#allocation6], 1024  }
   0xc   :  { %567 = vsyncadd [#allocation6], 4294966272  ;;  %s35_s0 = sld [smem:[#allocation4]] }
  0x12   :  { %p36_p0 = scmp.gt.s32.totalorder %s35_s0, 0  ;;  %p435_p1 = scmp.lt.s32.totalorder %s35_s0, 63 }
  0x14   :  { %s605_s0 = smov (!%p36_p0, %s35_s0), 0 }
  0x15   :  { %s607_s0 = smov (!%p435_p1, %s605_s0), 63 }
  0x16   :  { %s40_s20 = scalar_lea.vmem [#allocation5], %s607_s0 }
  0x17   :  { %v55_v0 = vld [vmem:[%s40_s20] sm:$0x1] }
  0x18   :  { %56 = vst [vmem:[#allocation8] sm:$0x1] %v55_v0 }
  0x19   :  { %74 = vsyncadd [#allocation2], 16  ;;  %s440_s21 = sld [smem:[#allocation4 + $0x1]] }
  0x1f   :  { %p77_p2 = scmp.gt.s32.totalorder %s440_s21, 0  ;;  %p441_p3 = scmp.lt.s32.totalorder %s440_s21, 63 }
  0x21   :  { %s609_s21 = smov (!%p77_p2, %s440_s21), 0 }
  0x22   :  { %s611_s21 = smov (!%p441_p3, %s609_s21), 63 }
  0x23   :  { %s81_s1 = scalar_lea.vmem [#allocation5], %s611_s21 }
  0x24   :  { %v97_v1 = vld [vmem:[%s81_s1] sm:$0x1] }
  0x25   :  { %98 = vst [vmem:[#allocation8 + $0x1] sm:$0x1] %v97_v1 }
  0x26   :  { %116 = vsyncadd [#allocation2], 16  ;;  %s446_s22 = sld [smem:[#allocation4 + $0x2]] }
  0x2c   :  { %p119_p4 = scmp.gt.s32.totalorder %s446_s22, 0  ;;  %p447_p5 = scmp.lt.s32.totalorder %s446_s22, 63 }
  0x2e   :  { %s613_s22 = smov (!%p119_p4, %s446_s22), 0 }
  0x2f   :  { %s615_s22 = smov (!%p447_p5, %s613_s22), 63 }
  0x30   :  { %s123_s23 = scalar_lea.vmem [#allocation5], %s615_s22 }
  0x31   :  { %v139_v2 = vld [vmem:[%s123_s23] sm:$0x1] }
  0x32   :  { %140 = vst [vmem:[#allocation8 + $0x2] sm:$0x1] %v139_v2 }
  0x33   :  { %158 = vsyncadd [#allocation2], 16  ;;  %s452_s24 = sld [smem:[#allocation4 + $0x3]] }
  0x39   :  { %p161_p6 = scmp.gt.s32.totalorder %s452_s24, 0  ;;  %p453_p7 = scmp.lt.s32.totalorder %s452_s24, 63 }
  0x3b   :  { %s617_s24 = smov (!%p161_p6, %s452_s24), 0 }
  0x3c   :  { %s619_s24 = smov (!%p453_p7, %s617_s24), 63 }
  0x3d   :  { %s165_s25 = scalar_lea.vmem [#allocation5], %s619_s24 }
  0x3e   :  { %v181_v3 = vld [vmem:[%s165_s25] sm:$0x1] }
  0x3f   :  { %182 = vst [vmem:[#allocation8 + $0x3] sm:$0x1] %v181_v3 }
  0x40   :  { %200 = vsyncadd [#allocation2], 16  ;;  %s458_s26 = sld [smem:[#allocation4 + $0x4]] }
  0x46   :  { %p203_p8 = scmp.gt.s32.totalorder %s458_s26, 0  ;;  %p459_p9 = scmp.lt.s32.totalorder %s458_s26, 63 }
  0x48   :  { %s621_s26 = smov (!%p203_p8, %s458_s26), 0 }
  0x49   :  { %s623_s26 = smov (!%p459_p9, %s621_s26), 63 }
  0x4a   :  { %s207_s27 = scalar_lea.vmem [#allocation5], %s623_s26 }
  0x4b   :  { %v223_v4 = vld [vmem:[%s207_s27] sm:$0x1] }
  0x4c   :  { %224 = vst [vmem:[#allocation8 + $0x4] sm:$0x1] %v223_v4 }
  0x4d   :  { %242 = vsyncadd [#allocation2], 16  ;;  %s464_s28 = sld [smem:[#allocation4 + $0x5]] }
  0x53   :  { %p245_p10 = scmp.gt.s32.totalorder %s464_s28, 0  ;;  %p465_p11 = scmp.lt.s32.totalorder %s464_s28, 63 }
  0x55   :  { %s625_s28 = smov (!%p245_p10, %s464_s28), 0 }
  0x56   :  { %s627_s28 = smov (!%p465_p11, %s625_s28), 63 }
  0x57   :  { %s249_s29 = scalar_lea.vmem [#allocation5], %s627_s28 }
  0x58   :  { %v265_v5 = vld [vmem:[%s249_s29] sm:$0x1] }
  0x59   :  { %266 = vst [vmem:[#allocation8 + $0x5] sm:$0x1] %v265_v5 }
  0x5a   :  { %284 = vsyncadd [#allocation2], 16  ;;  %s470_s30 = sld [smem:[#allocation4 + $0x6]] }
  0x60   :  { %p287_p12 = scmp.gt.s32.totalorder %s470_s30, 0  ;;  %p471_p13 = scmp.lt.s32.totalorder %s470_s30, 63 }
  0x62   :  { %s629_s30 = smov (!%p287_p12, %s470_s30), 0 }
  0x63   :  { %s631_s30 = smov (!%p471_p13, %s629_s30), 63 }
  0x64   :  { %s291_s3 = scalar_lea.vmem [#allocation5], %s631_s30 }
  0x65   :  { %v307_v6 = vld [vmem:[%s291_s3] sm:$0x1] }
  0x66   :  { %308 = vst [vmem:[#allocation8 + $0x6] sm:$0x1] %v307_v6 }
  0x67   :  { %326 = vsyncadd [#allocation2], 16  ;;  %s476_s4 = sld [smem:[#allocation4 + $0x7]] }
  0x6d   :  { %p329_p0 = scmp.gt.s32.totalorder %s476_s4, 0  ;;  %p477_p1 = scmp.lt.s32.totalorder %s476_s4, 63 }
  0x6f   :  { %s633_s4 = smov (!%p329_p0, %s476_s4), 0 }
  0x70   :  { %s635_s4 = smov (!%p477_p1, %s633_s4), 63 }
  0x71   :  { %s333_s5 = scalar_lea.vmem [#allocation5], %s635_s4 }
  0x72   :  { %v349_v7 = vld [vmem:[%s333_s5] sm:$0x1] }
  0x73   :  { %350 = vst [vmem:[#allocation8 + $0x7] sm:$0x1] %v349_v7 }
  0x74   :  { %368 = vsyncadd [#allocation2], 16 }
  0x75   :  { %568 = dma.done.wait [#allocation2], 128 }
  0x76   :  { %569 = vsyncadd [#allocation2], 4294967168  ;;  %s379_s8 = sshll.u32 %s603_s2, 4  ;;  %s576_s9 = smov [#allocation8]   ;;  %s380_s8 = int_to_ptr.hbm [resolvable:$true] %s379_s8 }
  0x77   :  { %s377_s10 = sshll.u32 %s576_s9, 4  ;;  %s378_s10 = int_to_ptr.vmem [resolvable:$true] %s377_s10 }
  0x78   :  { %382 = dma.vmem_to_hbm [thread:$0]  %s378_s10, 128, %s380_s8, [#allocation7]  }
  0x79   :  { %570 = dma.done.wait [#allocation7], 128  }
  0x7a   :  { %571 = vsyncadd [#allocation7], 4294967168 }
  0x7b   :  { %387 = vsyncpa [#allocation6], 1 }
  0x7c   :  { %388 = vsyncpa [#allocation7], 1 }
  0x7d   :  { %389 = vsyncmov [#allocation2] }
  0x80   :  { %s390_s11 = vpop.sfrf %389 }
  0x81   :  { %p482_p2 = scmp.ne.s32.totalorder %s390_s11, 0 }
  0x83   :  { %394 = shalt.err (%p482_p2)  }

</bundles_post_ra>
